<compile_context>
chip_gen: v5e
topology: v5e:2x2
jax: 0.10.0
libtpu: 0.0.40
codegen_flags: <defaults>
</compile_context>

<pallas_src>
import jax
import jax.numpy as jnp
from jax.experimental import pallas as pl
from jax.experimental.pallas import tpu as pltpu


def _tagging_kernel(x_ref, w1_ref, b1_ref, w2_ref, b2_ref, p_ref):
    # x_ref:  (TM, H) f32 token tile (pipelined over the grid)
    # w1_ref: (H, H)  bf16 W1 weight (in, out), grid-resident
    # b1_ref: (1, H)  f32 W1 bias, grid-resident
    # w2_ref: (8, H)  bf16 w2 row replicated over 8 sublanes, grid-resident
    # b2_ref: (1, 1)  f32 scalar in SMEM
    # p_ref:  (8, TM) f32 lane-dense output slab for this tile (rows identical)

    # Cast activations to bf16 in-kernel (VPU work, hidden under the MXU);
    # first layer on the MXU with f32 accumulation.
    x_bf16 = x_ref[...].astype(jnp.bfloat16)
    h1 = jnp.dot(x_bf16, w1_ref[...], preferred_element_type=jnp.float32)
    # Bias add + relu stay f32 on the VPU (safe on v5e which has no bf16 VALU).
    h1 = jnp.maximum(h1 + b1_ref[...], 0.0)

    # Second layer: logit[t] = <w2, h1[t, :]>. Trans-B contraction with bf16
    # operands -> single MXU pass, result lands lane-major as (8, TM).
    logits = jax.lax.dot_general(
        w2_ref[...], h1.astype(jnp.bfloat16),
        (((1,), (1,)), ((), ())),
        preferred_element_type=jnp.float32,
    )                                              # (8, TM); all rows identical
    # Keep all 8 rows: unmasked (8,128)-aligned store; extra sigmoid is EUP filler.
    p_ref[...] = jax.nn.sigmoid(logits + b2_ref[0, 0]).astype(p_ref.dtype)


def _vmem_budget_bytes():
    """Generation-aware working-set budget (~3/8 of per-core VMEM)."""
    cap = 64 * 1024 * 1024  # conservative default: v7x per-TensorCore VMEM
    try:
        info = pltpu.get_tpu_info()
        cap = int(getattr(info, "vmem_capacity_bytes", cap))
    except Exception:
        pass
    return (3 * cap) // 8  # 24 MiB on v7x, 48 MiB on v5e/v6e


def _working_set_bytes(tm, H, x_buffers):
    x_bytes = x_buffers * tm * H * 4        # pipelined f32 x tiles
    w1_bytes = H * H * 2                    # resident bf16 W1
    h1_bytes = tm * H * 4 + tm * H * 2      # f32 h1 + bf16 copy for 2nd dot
    out_bytes = 2 * 8 * tm * 4              # double-buffered (8, TM) f32 output
    misc = 32 * H * 4                       # biases, replicated w2, slack
    return x_bytes + w1_bytes + h1_bytes + out_bytes + misc


def _choose_tile_m(M, H, budget, x_buffers):
    """Largest TM (multiple of 128) whose working set fits the budget."""
    tm = 128
    for cand in (2048, 1024, 512, 256, 128):
        if _working_set_bytes(cand, H, x_buffers) <= budget:
            tm = cand
            break
    # Don't inflate tiny inputs far beyond a single tile (keep sublane multiple of 8).
    if M < tm:
        tm = max(8, ((M + 7) // 8) * 8)
    return tm


def rational_tagging(h_t, w1, b1, w2, b2):
    """h_t: (B, S, H) float32 -> (B, S, 1) float32 probabilities."""
    B, S, H = h_t.shape
    M = B * S

    budget = _vmem_budget_bytes()
    if _working_set_bytes(128, H, 2) > budget:
        # TODO(synk): add a K-tiled W1 path (stream W1 in (H, TK) slabs with an f32
        # h1 accumulator, reduction axis last + pl.when init/finalize) for very
        # large hidden sizes; the single-slab W1 would overflow v7x's VMEM budget.
        raise NotImplementedError(
            "hidden_size too large for single-slab W1 in VMEM; K-tiling not implemented")

    # Provisional tile with the default 2-deep pipeline, then decide whether a
    # 3-deep x pipeline is worthwhile (small-H / mem-bound with enough grid steps).
    tm0 = _choose_tile_m(M, H, budget, x_buffers=2)
    use_triple = (H <= 512) and (pl.cdiv(M, tm0) >= 3)
    x_buffers = 3 if use_triple else 2
    TM = _choose_tile_m(M, H, budget, x_buffers=x_buffers)
    num_tiles = pl.cdiv(M, TM)

    # No wrapper-side cast/pad of x: f32 straight from HBM, ragged tail handled
    # by Pallas block padding (garbage rows sliced off below).
    x = h_t.reshape(M, H)
    w1_b = w1.astype(jnp.bfloat16)
    b1_r = b1.reshape(1, H).astype(jnp.float32)
    w2_r = jnp.tile(w2.reshape(1, H).astype(jnp.bfloat16), (8, 1))  # 8-sublane replicate
    b2_s = b2.reshape(1, 1).astype(jnp.float32)

    vmem_need = _working_set_bytes(TM, H, x_buffers)
    vmem_limit = int(min(100 * 1024 * 1024,
                         max(16 * 1024 * 1024, vmem_need + 8 * 1024 * 1024)))

    cost = pl.CostEstimate(
        flops=int(2 * M * H * H + 2 * M * H + 2 * M * H),
        transcendentals=int(8 * num_tiles * TM),
        bytes_accessed=int(M * H * 4 + H * H * 2 + num_tiles * 8 * TM * 4 + 10 * H * 4 + 4),
    )

    if use_triple:
        x_spec = pl.BlockSpec((TM, H), lambda i: (i, 0), pipeline_mode=pl.Buffered(3))
    else:
        x_spec = pl.BlockSpec((TM, H), lambda i: (i, 0))

    out = pl.pallas_call(
        _tagging_kernel,
        out_shape=jax.ShapeDtypeStruct((num_tiles, 8, TM), jnp.float32),
        grid_spec=pltpu.PrefetchScalarGridSpec(
            num_scalar_prefetch=0,
            grid=(num_tiles,),
            in_specs=[
                x_spec,                                             # x tile (pipelined)
                pl.BlockSpec((H, H), lambda i: (0, 0)),             # W1, resident
                pl.BlockSpec((1, H), lambda i: (0, 0)),             # b1, resident
                pl.BlockSpec((8, H), lambda i: (0, 0)),             # w2 rows, resident
                pl.BlockSpec(memory_space=pltpu.MemorySpace.SMEM),  # b2 scalar
            ],
            out_specs=pl.BlockSpec((None, 8, TM), lambda i: (i, 0, 0)),  # (8,128)-aligned slab
        ),
        compiler_params=pltpu.CompilerParams(
            dimension_semantics=("parallel",),   # megacore split on v7x
            vmem_limit_bytes=vmem_limit,
        ),
        cost_estimate=cost,
    )(x, w1_b, b1_r, w2_r, b2_s)

    # (num_tiles, 8, TM) slab -> (B, S, 1): take one of the identical rows,
    # drop any padded tail rows. Pure layout plumbing in the wrapper.
    return out[:, 0, :].reshape(num_tiles * TM)[:M].reshape(B, S, 1)


def init_params(key, hidden_size):
    """Deterministic init mimicking nn.Linear's U(-1/sqrt(fan_in), 1/sqrt(fan_in))."""
    k1, k2, k3, k4 = jax.random.split(key, 4)
    bound1 = 1.0 / jnp.sqrt(hidden_size)
    w1 = jax.random.uniform(k1, (hidden_size, hidden_size), jnp.float32, -bound1, bound1)
    b1 = jax.random.uniform(k2, (hidden_size,), jnp.float32, -bound1, bound1)
    w2 = jax.random.uniform(k3, (hidden_size, 1), jnp.float32, -bound1, bound1)
    b2 = jax.random.uniform(k4, (1,), jnp.float32, -bound1, bound1)
    return w1, b1, w2, b2


if __name__ == "__main__":
    key = jax.random.PRNGKey(0)
    k_x, k_p = jax.random.split(key)

    batch, seq, hidden = 2, 8, 32
    h_t = jax.random.normal(k_x, (batch, seq, hidden), jnp.float32)
    w1, b1, w2, b2 = init_params(k_p, hidden)

    p = rational_tagging(h_t, w1, b1, w2, b2)
    p = jax.block_until_ready(p)

    # Pure-JAX f32 reference of the PyTorch forward. The kernel uses bf16 MXU
    # operands with f32 accumulation, so tolerance is loosened accordingly.
    ref = jax.nn.sigmoid(jnp.maximum(h_t @ w1 + b1, 0.0) @ w2 + b2)
    assert p.shape == (batch, seq, 1)
    assert jnp.allclose(p, ref, atol=1e-2, rtol=1e-2)

    print("KERNEL_OK")
</pallas_src>

<mosaic_0001>
module attributes {stable_mosaic.version = 11 : i64} {
  func.func @_tagging_kernel(%arg0: i32, %arg1: memref<16x32xf32, #tpu.memory_space<vmem>>, %arg2: memref<32x32xbf16, #tpu.memory_space<vmem>>, %arg3: memref<1x32xf32, #tpu.memory_space<vmem>>, %arg4: memref<8x32xbf16, #tpu.memory_space<vmem>>, %arg5: memref<1x1xf32, #tpu.memory_space<smem>>, %arg6: memref<1x8x16xf32, #tpu.memory_space<vmem>>) attributes {dimension_semantics = [#tpu.dimension_semantics<parallel>], iteration_bounds = array<i64: 1>, scalar_prefetch = 0 : i64, scratch_operands = 0 : i64, tpu.core_type = #tpu.core_type<tc>, window_params = [{transform_indices = @transform_0, window_bounds = array<i64: 16, 32>}, {pipeline_mode = #tpu.pipeline_mode<synchronous>, transform_indices = @transform_1, window_bounds = array<i64: 32, 32>}, {pipeline_mode = #tpu.pipeline_mode<synchronous>, transform_indices = @transform_2, window_bounds = array<i64: 1, 32>}, {pipeline_mode = #tpu.pipeline_mode<synchronous>, transform_indices = @transform_3, window_bounds = array<i64: 8, 32>}, {transform_indices = @transform_4, window_bounds = array<i64: 1, 1>}, {transform_indices = @transform_5, window_bounds = array<i64: 1, 8, 16>}]} {
    %c0 = arith.constant 0 : index
    %c0_0 = arith.constant 0 : index
    %0 = vector.load %arg1[%c0, %c0_0] : memref<16x32xf32, #tpu.memory_space<vmem>>, vector<16x32xf32>
    %1 = arith.truncf %0 : vector<16x32xf32> to vector<16x32xbf16>
    %c0_1 = arith.constant 0 : index
    %c0_2 = arith.constant 0 : index
    %2 = vector.load %arg2[%c0_1, %c0_2] : memref<32x32xbf16, #tpu.memory_space<vmem>>, vector<32x32xbf16>
    %cst = arith.constant dense<0.000000e+00> : vector<16x32xf32>
    %3 = tpu.matmul %1, %2, %cst {dimension_numbers = #tpu.dot_dimension_numbers<[1], [0], [0], [1], [0, 0, 1, 1], [], []>} : vector<16x32xbf16>, vector<32x32xbf16>, vector<16x32xf32> -> vector<16x32xf32>
    %c0_3 = arith.constant 0 : index
    %c0_4 = arith.constant 0 : index
    %4 = vector.load %arg3[%c0_3, %c0_4] : memref<1x32xf32, #tpu.memory_space<vmem>>, vector<1x32xf32>
    %5 = vector.broadcast %4 : vector<1x32xf32> to vector<16x32xf32>
    %6 = arith.addf %3, %5 : vector<16x32xf32>
    %cst_5 = arith.constant 0.000000e+00 : f32
    %7 = vector.broadcast %cst_5 : f32 to vector<16x32xf32>
    %8 = arith.maximumf %6, %7 : vector<16x32xf32>
    %c0_6 = arith.constant 0 : index
    %c0_7 = arith.constant 0 : index
    %9 = vector.load %arg4[%c0_6, %c0_7] : memref<8x32xbf16, #tpu.memory_space<vmem>>, vector<8x32xbf16>
    %10 = arith.truncf %8 : vector<16x32xf32> to vector<16x32xbf16>
    %cst_8 = arith.constant dense<0.000000e+00> : vector<8x16xf32>
    %11 = tpu.matmul %9, %10, %cst_8 {dimension_numbers = #tpu.dot_dimension_numbers<[1], [1], [0], [0], [0, 0, 1, 0], [], []>} : vector<8x32xbf16>, vector<16x32xbf16>, vector<8x16xf32> -> vector<8x16xf32>
    %c0_9 = arith.constant 0 : index
    %c0_10 = arith.constant 0 : index
    %12 = memref.load %arg5[%c0_9, %c0_10] : memref<1x1xf32, #tpu.memory_space<smem>>
    %13 = vector.broadcast %12 : f32 to vector<8x16xf32>
    %14 = arith.addf %11, %13 : vector<8x16xf32>
    %15 = arith.negf %14 : vector<8x16xf32>
    %16 = math.exp %15 : vector<8x16xf32>
    %cst_11 = arith.constant 1.000000e+00 : f32
    %17 = vector.broadcast %cst_11 : f32 to vector<8x16xf32>
    %18 = arith.addf %17, %16 : vector<8x16xf32>
    %19 = arith.divf %17, %18 : vector<8x16xf32>
    %c0_12 = arith.constant 0 : index
    %c0_13 = arith.constant 0 : index
    %c0_14 = arith.constant 0 : index
    %20 = vector.load %arg6[%c0_12, %c0_13, %c0_14] : memref<1x8x16xf32, #tpu.memory_space<vmem>>, vector<1x8x16xf32>
    %21 = vector.shape_cast %20 : vector<1x8x16xf32> to vector<8x16xf32>
    %22 = vector.shape_cast %19 : vector<8x16xf32> to vector<1x8x16xf32>
    tpu.vector_store %arg6[%c0_12, %c0_13, %c0_14], %22 {strides = array<i32>} : memref<1x8x16xf32, #tpu.memory_space<vmem>>, vector<1x8x16xf32>,
    return
  }
  func.func @transform_0(%arg0: i32) -> (i32, i32) {
    %c0_i32 = arith.constant 0 : i32
    %c0_i32_0 = arith.constant 0 : i32
    return %arg0, %c0_i32 : i32, i32
  }
  func.func @transform_1(%arg0: i32) -> (i32, i32) {
    %c0_i32 = arith.constant 0 : i32
    %c0_i32_0 = arith.constant 0 : i32
    %c0_i32_1 = arith.constant 0 : i32
    return %c0_i32, %c0_i32_0 : i32, i32
  }
  func.func @transform_2(%arg0: i32) -> (i32, i32) {
    %c0_i32 = arith.constant 0 : i32
    %c0_i32_0 = arith.constant 0 : i32
    %c0_i32_1 = arith.constant 0 : i32
    return %c0_i32, %c0_i32_0 : i32, i32
  }
  func.func @transform_3(%arg0: i32) -> (i32, i32) {
    %c0_i32 = arith.constant 0 : i32
    %c0_i32_0 = arith.constant 0 : i32
    %c0_i32_1 = arith.constant 0 : i32
    return %c0_i32, %c0_i32_0 : i32, i32
  }
  func.func @transform_4(%arg0: i32) -> (i32, i32) {
    %c0_i32 = arith.constant 0 : i32
    %c0_i32_0 = arith.constant 0 : i32
    %c0_i32_1 = arith.constant 0 : i32
    return %c0_i32, %c0_i32_0 : i32, i32
  }
  func.func @transform_5(%arg0: i32) -> (i32, i32, i32) {
    %c0_i32 = arith.constant 0 : i32
    %c0_i32_0 = arith.constant 0 : i32
    %c0_i32_1 = arith.constant 0 : i32
    return %arg0, %c0_i32, %c0_i32_0 : i32, i32, i32
  }
}

</mosaic_0001>

<bundles_post_ra>
// kernel: tpu_custom_call.1
= control target key start
LH: loop header
LB: loop body
LE: loop exit
PB: predicated region body
PF: predicated region fallthrough
CT: control target
= control target key end

     0   :  { %11 = vsyncpa [#allocation4], 0  ;;  %s357_s0 = inlined_call_operand.hbm [shape: f32[16,32], index: 0, kind: input, shape index: {}]   ;;  %s358_s1 = inlined_call_operand.hbm [shape: bf16[32,32], index: 1, kind: input, shape index: {}]   ;;  %s359_s2 = inlined_call_operand.hbm [shape: f32[1,32], index: 2, kind: input, shape index: {}]   ;;  %s360_s3 = inlined_call_operand.vmem [shape: bf16[8,32], index: 3, kind: input, shape index: {}]   ;;  %s361_s4 = inlined_call_operand.<no memory space> [shape: f32[1,1], index: 4, kind: input, shape index: {}]   ;;  %s362_s5 = inlined_call_operand.hbm [shape: f32[1,8,16], index: 5, kind: output, shape index: {}]  }
   0x1   :  { %12 = vsyncpa [#allocation7], 0  ;;  %s31_s20 = sshll.u32 %s358_s1, 4  ;;  %s32_s20 = int_to_ptr.hbm [resolvable:$true] %s31_s20 }
   0x2   :  { %13 = vsyncpa [#allocation5], 0  ;;  %s301_s21 = smov [#allocation6]   ;;  %s18_s25 = sshll.u32 %s357_s0, 4  ;;  %s19_s25 = int_to_ptr.hbm [resolvable:$true] %s18_s25 }
   0x3   :  { %s33_s22 = sshll.u32 %s301_s21, 4  ;;  %s302_s26 = smov 64   ;;  %s34_s22 = int_to_ptr.vmem [resolvable:$true] %s33_s22 }
   0x4   :  { %s303_s27 = smov 4   ;;  %s304_s28 = smov [#allocation3]  }
   0x5   :  { %39 = dma.hbm_to_vmem [thread:$0]  %s32_s20, 256, %s34_s22, [#allocation7], %s302_s26, %s302_s26, %s303_s27  }
   0x6   :  { %s20_s29 = sshll.u32 %s304_s28, 4  ;;  %s305_s30 = smov 128   ;;  %s21_s29 = int_to_ptr.vmem [resolvable:$true] %s20_s29 }
   0x7   :  { %s306_s6 = smov 8   ;;  %s45_s8 = sshll.u32 %s359_s2, 4  ;;  %s46_s8 = int_to_ptr.hbm [resolvable:$true] %s45_s8 }
   0x8   :  { %26 = dma.hbm_to_vmem [thread:$0]  %s19_s25, 256, %s21_s29, [#allocation4], %s305_s30, %s305_s30, %s306_s6  }
   0x9   :  { %s307_s9 = smov [#allocation8]  }
   0xa   :  { %s47_s10 = sshll.u32 %s307_s9, 4  ;;  %s48_s10 = int_to_ptr.vmem [resolvable:$true] %s47_s10 }
   0xb   :  { %50 = dma.hbm_to_vmem [thread:$0]  %s46_s8, 16, %s48_s10, [#allocation7]  }
   0xc   :  { %295 = dma.done.wait [#allocation4], 256  }
   0xd   :  { %296 = vsyncadd [#allocation4], 4294967040 }
   0xe   :  { %297 = dma.done.wait [#allocation7], 272  }
   0xf   :  { %298 = vsyncadd [#allocation7], 4294967024  ;;  %v185_v0 = vld [vmem:[#allocation6 + $0x8] sm:$0xff]  ;;  %v184_v1 = vld [vmem:[#allocation6] sm:$0xff]  ;;  %vm91_vm0 = vcmask 261120   ;;  %v114_v15 = vstv %s361_s4  ;;  %s162_s4 = sshll.u32 %s362_s5, 4  ;;  %s163_s4 = int_to_ptr.hbm [resolvable:$true] %s162_s4 }
  0x10   :  { %101 = vmatpush.bf16.msra.mxu0 %v185_v0  ;;  %v68_v2 = vld [vmem:[#allocation3] sm:$0xff]  ;;  %v69_v3 = vld [vmem:[#allocation3 + $0x8] sm:$0xff]  ;;  %vm153_vm4 = vcmask 130048  }
  0x11   :  { %v70_v4 = vpack.c.bf16 %v69_v3, %v68_v2  ;;  %v194_v6 = vld [vmem:[#allocation8] ss:$0 sm:$0xff] }
  0x12   :  { %v111_v14 = vld [vmem:[%s360_s3] sm:$0xf]  ;;  %s308_s3 = smov [#allocation9]  }
  0x13   :  { %s160_s13 = sshll.u32 %s308_s3, 4  ;;  %s161_s13 = int_to_ptr.vmem [resolvable:$true] %s160_s13 }
  0x14   :  { %102 = vmatpush.bf16.msra.mxu0 %v184_v1 }
  0x17   :  { %181 = vmatmul.msk.bf16.vlgmr.msra.gmra.mxu0 %vm91_vm0, %v70_v4 }
  0x94   :  { %v104_v5 = vpop.f32.mrf.mxu0 }
  0x95   :  { %v105_v7 = vadd.f32 %v194_v6, %v104_v5 }
  0x97   :  { %v109_v10 = vmax.f32 %v105_v7, 0.0 }
  0x9c   :  { %v106_v8 = vpop.f32.mrf.mxu0 }
  0x9d   :  { %v107_v9 = vadd.f32 %v194_v6, %v106_v8 }
  0x9f   :  { %v110_v11 = vmax.f32 %v107_v9, 0.0 }
  0xa1   :  { %v112_v12 = vpack.c.bf16 %v110_v11, %v109_v10 }
  0xa3   :  { %v119_v13 = vsel %vm91_vm0, %v112_v12, 0 }
  0xa4   :  { %128 = vmatpush.bf16.xpose.msra.mxu1 %v119_v13 }
  0xab   :  { %182 = vmatmul.msk.bf16.vlgmr.msra.gmra.mxu1 %vm91_vm0, %v111_v14 }
 0x128   :  { %v130_v16 = vpop.f32.mrf.mxu1 }
 0x129   :  { %v131_v17 = vadd.f32 %v130_v16, %v114_v15 }
 0x12b   :  { %v183_v18 = vmul.f32 -1.442695, %v131_v17 }
 0x12d   :  { %195 = vpow2.f32 %v183_v18 }
 0x130   :  { %v132_v19 = vpop.f32.mrf.mxu1 }
 0x133   :  { %v196_v20 = vpop.eup %195 }
 0x134   :  { %v137_v21 = vadd.f32 1.0, %v196_v20 }
 0x136   :  { %197 = vrcp.f32 %v137_v21  ;;  %v149_v25 = vand.u32 2147483648, %v137_v21  ;;  %v147_v27 = vand.u32 2147483647, %v137_v21  ;;  %vm143_vm2 = vweird.f32 %v137_v21 }
 0x138   :  { %v150_v29 = vor.u32 1.1754944e-38, %v149_v25  ;;  %vm148_vm5 = vcmp.eq.f32.partialorder %v147_v27, 8.507059e+37 }
 0x13c   :  { %v198_v22 = vpop.eup %197 }
 0x13d   :  { %v139_v23 = vmul.f32 %v198_v22, %v137_v21  ;;  %vm144_vm1 = vweird.f32 %v198_v22 }
 0x13e   :  { %vm145_vm3 = vmor %vm143_vm2, %vm144_vm1 }
 0x13f   :  { %v140_v24 = vsub.f32 1.0, %v139_v23 }
 0x141   :  { %v141_v26 = vmul.f32 %v198_v22, %v140_v24 }
 0x143   :  { %v142_v28 = vadd.f32 %v198_v22, %v141_v26 }
 0x145   :  { %v146_v30 = vsel %vm145_vm3, %v198_v22, %v142_v28 }
 0x146   :  { %v151_v31 = vsel %vm148_vm5, %v150_v29, %v146_v30 }
 0x147   :  { %154 = vst.msk [vmem:[#allocation9] sm:$0xff] %vm153_vm4, %v151_v31 }
 0x148   :  { %165 = dma.vmem_to_hbm [thread:$0]  %s161_s13, 128, %s163_s4, [#allocation5]  }
 0x149   :  { %299 = dma.done.wait [#allocation5], 128  }
 0x14a   :  { %300 = vsyncadd [#allocation5], 4294967168 }
 0x14b   :  { %170 = vsyncpa [#allocation4], 1 }
 0x14c   :  { %171 = vsyncpa [#allocation7], 1 }
 0x14d   :  { %172 = vsyncpa [#allocation5], 1 }

</bundles_post_ra>
